<compile_context>
chip_gen: v7x
topology: tpu7x:2x2x1
jax: 0.10.0
libtpu: 0.0.40
codegen_flags: <defaults>
</compile_context>

<pallas_src>
import functools
import math

import jax
import jax.numpy as jnp
from jax.experimental import pallas as pl
from jax.experimental.pallas import tpu as pltpu

OBS_DIM = 4
HID_DIM = 64
ACT_DIM = 1

_NEG_HALF_LOG_2PI = -0.5 * math.log(2.0 * math.pi)


def _policy_logprob_kernel(s_ref, a_ref, w1_ref, b1_ref, w2_ref, b2_ref, out_ref,
                           *, block_lanes, chunk):
    """One batch tile: s_ref (OBS, bt), a_ref/out_ref (ACT, bt), weights resident."""
    num_full = block_lanes // chunk
    rem = block_lanes - num_full * chunk

    # Weights / biases are tiny and grid-resident; load once per grid step.
    w1 = w1_ref[...]                                        # (HID, OBS)
    w2 = w2_ref[...]                                        # (ACT, HID) -> MXU layer 2
    b2 = b2_ref[0]                                          # SMEM scalar
    # Hoist the lane-broadcast of b1 out of the chunk loop (JAX does not CSE it).
    b1b = jnp.broadcast_to(b1_ref[...], (HID_DIM, chunk))   # (HID, chunk)

    def compute(off, size):
        # Layer 1 on the MXU: (HID, OBS) @ (OBS, size) -> (HID, size).
        h = jnp.dot(w1, s_ref[:, pl.ds(off, size)],
                    preferred_element_type=jnp.float32)
        h = jnp.maximum(h + b1b[:, :size], 0.0)
        # Layer 2 on the MXU as well (N=1 output stays lane-dense (ACT, size)).
        mean = jnp.dot(w2, h, preferred_element_type=jnp.float32) + b2
        # Normal(mean, 1.0).log_prob(a) = -0.5*(a-mean)^2 - 0.5*log(2*pi)
        diff = a_ref[:, pl.ds(off, size)] - mean
        out_ref[:, pl.ds(off, size)] = (
            -0.5 * (diff * diff) + _NEG_HALF_LOG_2PI
        ).astype(out_ref.dtype)

    if num_full == 1 and rem == 0:
        compute(0, chunk)
    else:
        # 512-lane chunks keep the (HID, chunk) activation in vregs; unroll only
        # short trip-counts to keep code size sane.
        @pl.loop(0, num_full, unroll=num_full <= 8)
        def _(c):
            compute(pl.multiple_of(c * chunk, chunk), chunk)

        if rem:  # static tail when the batch tile is not a multiple of `chunk`
            compute(num_full * chunk, rem)


def policy_log_prob(s, a, w1, b1, w2, b2, *, block_b=32768, lane_chunk=512,
                    s_transposed=False, core_parallel=False):
    """Compute Normal(pi_net(s), 1).log_prob(a) with a Pallas TPU kernel.

    s : (B, OBS_DIM) float  (or (OBS_DIM, B) if s_transposed=True)
    a : (B, ACT_DIM) float
    w1: (HID_DIM, OBS_DIM)  PyTorch nn.Linear layout, b1: (HID_DIM,)
    w2: (ACT_DIM, HID_DIM)  PyTorch nn.Linear layout, b2: (ACT_DIM,)
    Returns (B, ACT_DIM) float32.
    """
    assert lane_chunk % 128 == 0, "lane_chunk must be a multiple of 128"
    s = jnp.asarray(s, jnp.float32)
    a = jnp.asarray(a, jnp.float32)

    B = s.shape[1] if s_transposed else s.shape[0]

    # Lane-dense layout: batch on the last (lane) axis everywhere.
    # For best end-to-end perf the caller should provide s already as
    # (OBS_DIM, B) (s_transposed=True) so no standalone XLA transpose of s is
    # materialized; a / out are (B,1) <-> (1,B) reshapes, which are free.
    s_t = s if s_transposed else s.T                         # (OBS_DIM, B)
    assert s_t.shape == (OBS_DIM, B)
    a_row = a.reshape(ACT_DIM, B)                            # free for ACT_DIM == 1

    w1_m = jnp.asarray(w1, jnp.float32).reshape(HID_DIM, OBS_DIM)
    b1_col = jnp.asarray(b1, jnp.float32).reshape(HID_DIM, 1)
    w2_row = jnp.asarray(w2, jnp.float32).reshape(ACT_DIM, HID_DIM)
    b2_s = jnp.asarray(b2, jnp.float32).reshape(ACT_DIM)     # -> SMEM scalar

    # Batch tile: whole batch if small, else a lane-dense multiple of 128.
    if B > block_b:
        assert block_b % 128 == 0, "batch tile must be a multiple of 128 (lane axis)"
        bt = block_b
    else:
        bt = B
    grid = (pl.cdiv(B, bt),)
    chunk = min(lane_chunk, bt)

    kernel = functools.partial(_policy_logprob_kernel, block_lanes=bt, chunk=chunk)

    # On v7x CORE_PARALLEL actually shards the batch axis across the 2 TensorCores;
    # plain PARALLEL is kept as the safe default for single-core chips (v5e/v6e).
    dim_sem = (pltpu.CORE_PARALLEL,) if core_parallel else (pltpu.PARALLEL,)

    flops = 2 * B * (OBS_DIM * HID_DIM + HID_DIM * ACT_DIM) + 4 * B * ACT_DIM
    bytes_accessed = 4 * (
        B * (OBS_DIM + 2 * ACT_DIM)                  # s, a, out streams
        + HID_DIM * (OBS_DIM + 1 + ACT_DIM)          # weights + biases
        + ACT_DIM
    )

    out_row = pl.pallas_call(
        kernel,
        out_shape=jax.ShapeDtypeStruct((ACT_DIM, B), jnp.float32),
        grid=grid,
        in_specs=[
            pl.BlockSpec((OBS_DIM, bt), lambda i: (0, i)),        # s^T, batch-tiled
            pl.BlockSpec((ACT_DIM, bt), lambda i: (0, i)),        # a row, batch-tiled
            pl.BlockSpec((HID_DIM, OBS_DIM), lambda i: (0, 0)),   # W1 (resident)
            pl.BlockSpec((HID_DIM, 1), lambda i: (0, 0)),         # b1 column
            pl.BlockSpec((ACT_DIM, HID_DIM), lambda i: (0, 0)),   # W2 row
            pl.BlockSpec(memory_space=pltpu.MemorySpace.SMEM),    # b2 scalar
        ],
        out_specs=pl.BlockSpec((ACT_DIM, bt), lambda i: (0, i)),
        compiler_params=pltpu.CompilerParams(dimension_semantics=dim_sem),
        cost_estimate=pl.CostEstimate(
            flops=flops, transcendentals=0, bytes_accessed=bytes_accessed
        ),
    )(s_t, a_row, w1_m, b1_col, w2_row, b2_s)

    return out_row.reshape(B, ACT_DIM)


def _reference(s, a, w1, b1, w2, b2):
    h = jnp.maximum(s @ w1.T + b1, 0.0)
    mean = h @ w2.T + b2
    return -0.5 * (a - mean) ** 2 + _NEG_HALF_LOG_2PI


if __name__ == "__main__":
    key = jax.random.PRNGKey(0)
    _, _, k_w1, k_b1, k_w2, k_b2 = jax.random.split(key, 6)

    # Deterministic parameter init (mimics nn.Linear uniform(-1/sqrt(in), 1/sqrt(in))).
    lim1 = 1.0 / math.sqrt(OBS_DIM)
    lim2 = 1.0 / math.sqrt(HID_DIM)
    w1 = jax.random.uniform(k_w1, (HID_DIM, OBS_DIM), jnp.float32, -lim1, lim1)
    b1 = jax.random.uniform(k_b1, (HID_DIM,), jnp.float32, -lim1, lim1)
    w2 = jax.random.uniform(k_w2, (ACT_DIM, HID_DIM), jnp.float32, -lim2, lim2)
    b2 = jax.random.uniform(k_b2, (ACT_DIM,), jnp.float32, -lim2, lim2)

    def check(B, **kw):
        ks, ka = jax.random.split(jax.random.fold_in(key, B))
        s = jax.random.normal(ks, (B, OBS_DIM), dtype=jnp.float32)
        a = jax.random.normal(ka, (B, ACT_DIM), dtype=jnp.float32)
        out = jax.block_until_ready(policy_log_prob(s, a, w1, b1, w2, b2, **kw))
        ref = _reference(s, a, w1, b1, w2, b2)
        assert out.shape == (B, ACT_DIM)
        assert jnp.allclose(out, ref, atol=1e-5, rtol=1e-5), f"mismatch (B={B})"
        return s, a, out

    # Small batch: single block, block shape == full array dims.
    check(8)
    # Multi-chunk in-kernel loop (3 x 512-lane chunks).
    check(1536)
    # Gridded case with a padded last batch tile (exercises tiling + masking).
    check(200, block_b=128)
    # Non-multiple-of-chunk batch (512-lane chunk + 136-lane tail).
    check(648)
    # Caller-provided (OBS_DIM, B) layout fast path (no XLA transpose of s).
    s_chk, a_chk, out_chk = check(256)
    out_t = jax.block_until_ready(
        policy_log_prob(s_chk.T, a_chk, w1, b1, w2, b2, s_transposed=True)
    )
    assert jnp.array_equal(out_t, out_chk), "s_transposed fast path mismatch"

    print("KERNEL_OK")
</pallas_src>

<mosaic_0001>
module attributes {stable_mosaic.version = 11 : i64} {
  func.func @_policy_logprob_kernel(%arg0: i32, %arg1: memref<4x8xf32, #tpu.memory_space<vmem>>, %arg2: memref<1x8xf32, #tpu.memory_space<vmem>>, %arg3: memref<64x4xf32, #tpu.memory_space<vmem>>, %arg4: memref<64x1xf32, #tpu.memory_space<vmem>>, %arg5: memref<1x64xf32, #tpu.memory_space<vmem>>, %arg6: memref<1xf32, #tpu.memory_space<smem>>, %arg7: memref<1x8xf32, #tpu.memory_space<vmem>>) attributes {dimension_semantics = [#tpu.dimension_semantics<parallel>], iteration_bounds = array<i64: 1>, scalar_prefetch = 0 : i64, scratch_operands = 0 : i64, tpu.core_type = #tpu.core_type<tc>, window_params = [{transform_indices = @transform_0, window_bounds = array<i64: 4, 8>}, {transform_indices = @transform_1, window_bounds = array<i64: 1, 8>}, {pipeline_mode = #tpu.pipeline_mode<synchronous>, transform_indices = @transform_2, window_bounds = array<i64: 64, 4>}, {pipeline_mode = #tpu.pipeline_mode<synchronous>, transform_indices = @transform_3, window_bounds = array<i64: 64, 1>}, {pipeline_mode = #tpu.pipeline_mode<synchronous>, transform_indices = @transform_4, window_bounds = array<i64: 1, 64>}, {transform_indices = @transform_5, window_bounds = array<i64: 1>}, {transform_indices = @transform_6, window_bounds = array<i64: 1, 8>}]} {
    %c0 = arith.constant 0 : index
    %c0_0 = arith.constant 0 : index
    %0 = vector.load %arg3[%c0, %c0_0] : memref<64x4xf32, #tpu.memory_space<vmem>>, vector<64x4xf32>
    %c0_1 = arith.constant 0 : index
    %c0_2 = arith.constant 0 : index
    %1 = vector.load %arg5[%c0_1, %c0_2] : memref<1x64xf32, #tpu.memory_space<vmem>>, vector<1x64xf32>
    %c0_3 = arith.constant 0 : index
    %2 = memref.load %arg6[%c0_3] : memref<1xf32, #tpu.memory_space<smem>>
    %c0_4 = arith.constant 0 : index
    %c0_5 = arith.constant 0 : index
    %3 = vector.load %arg4[%c0_4, %c0_5] : memref<64x1xf32, #tpu.memory_space<vmem>>, vector<64x1xf32>
    %4 = vector.shape_cast %3 : vector<64x1xf32> to vector<64x1xf32>
    %5 = vector.broadcast %4 : vector<64x1xf32> to vector<64x8xf32>
    %c0_6 = arith.constant 0 : index
    %c0_7 = arith.constant 0 : index
    %6 = vector.load %arg1[%c0_6, %c0_7] : memref<4x8xf32, #tpu.memory_space<vmem>>, vector<4x8xf32>
    %cst = arith.constant dense<0.000000e+00> : vector<64x8xf32>
    %7 = tpu.matmul %0, %6, %cst {dimension_numbers = #tpu.dot_dimension_numbers<[1], [0], [0], [1], [0, 0, 1, 1], [], []>} : vector<64x4xf32>, vector<4x8xf32>, vector<64x8xf32> -> vector<64x8xf32>
    %8 = arith.addf %7, %5 : vector<64x8xf32>
    %cst_8 = arith.constant 0.000000e+00 : f32
    %9 = vector.broadcast %cst_8 : f32 to vector<64x8xf32>
    %10 = arith.maximumf %8, %9 : vector<64x8xf32>
    %cst_9 = arith.constant dense<0.000000e+00> : vector<1x8xf32>
    %11 = tpu.matmul %1, %10, %cst_9 {dimension_numbers = #tpu.dot_dimension_numbers<[1], [0], [0], [1], [0, 0, 1, 1], [], []>} : vector<1x64xf32>, vector<64x8xf32>, vector<1x8xf32> -> vector<1x8xf32>
    %12 = vector.broadcast %2 : f32 to vector<1x8xf32>
    %13 = arith.addf %11, %12 : vector<1x8xf32>
    %c0_10 = arith.constant 0 : index
    %c0_11 = arith.constant 0 : index
    %14 = vector.load %arg2[%c0_10, %c0_11] : memref<1x8xf32, #tpu.memory_space<vmem>>, vector<1x8xf32>
    %15 = arith.subf %14, %13 : vector<1x8xf32>
    %16 = arith.mulf %15, %15 : vector<1x8xf32>
    %cst_12 = arith.constant -5.000000e-01 : f32
    %17 = vector.broadcast %cst_12 : f32 to vector<1x8xf32>
    %18 = arith.mulf %17, %16 : vector<1x8xf32>
    %cst_13 = arith.constant -0.918938517 : f32
    %19 = vector.broadcast %cst_13 : f32 to vector<1x8xf32>
    %20 = arith.addf %18, %19 : vector<1x8xf32>
    %c0_14 = arith.constant 0 : index
    %c0_15 = arith.constant 0 : index
    %21 = vector.load %arg7[%c0_14, %c0_15] : memref<1x8xf32, #tpu.memory_space<vmem>>, vector<1x8xf32>
    tpu.vector_store %arg7[%c0_14, %c0_15], %20 {strides = array<i32>} : memref<1x8xf32, #tpu.memory_space<vmem>>, vector<1x8xf32>,
    return
  }
  func.func @transform_0(%arg0: i32) -> (i32, i32) {
    %c0_i32 = arith.constant 0 : i32
    %c0_i32_0 = arith.constant 0 : i32
    return %c0_i32, %arg0 : i32, i32
  }
  func.func @transform_1(%arg0: i32) -> (i32, i32) {
    %c0_i32 = arith.constant 0 : i32
    %c0_i32_0 = arith.constant 0 : i32
    return %c0_i32, %arg0 : i32, i32
  }
  func.func @transform_2(%arg0: i32) -> (i32, i32) {
    %c0_i32 = arith.constant 0 : i32
    %c0_i32_0 = arith.constant 0 : i32
    %c0_i32_1 = arith.constant 0 : i32
    return %c0_i32, %c0_i32_0 : i32, i32
  }
  func.func @transform_3(%arg0: i32) -> (i32, i32) {
    %c0_i32 = arith.constant 0 : i32
    %c0_i32_0 = arith.constant 0 : i32
    %c0_i32_1 = arith.constant 0 : i32
    return %c0_i32, %c0_i32_0 : i32, i32
  }
  func.func @transform_4(%arg0: i32) -> (i32, i32) {
    %c0_i32 = arith.constant 0 : i32
    %c0_i32_0 = arith.constant 0 : i32
    %c0_i32_1 = arith.constant 0 : i32
    return %c0_i32, %c0_i32_0 : i32, i32
  }
  func.func @transform_5(%arg0: i32) -> i32 {
    %c0_i32 = arith.constant 0 : i32
    %c0_i32_0 = arith.constant 0 : i32
    return %c0_i32 : i32
  }
  func.func @transform_6(%arg0: i32) -> (i32, i32) {
    %c0_i32 = arith.constant 0 : i32
    %c0_i32_0 = arith.constant 0 : i32
    return %c0_i32, %arg0 : i32, i32
  }
}

</mosaic_0001>

<bundles_post_ra>
// kernel: tpu_custom_call.1
= control target key start
LH: loop header
LB: loop body
LE: loop exit
PB: predicated region body
PF: predicated region fallthrough
CT: control target
= control target key end

     0   :  { %vm109_vm0 = vcmask 1043456   ;;  %vm84_vm1 = vcmask 31744   ;;  %v426_v4 = vmov 0   ;;  %s546_s0 = inlined_call_operand.vmem [shape: f32[4,8], index: 0, kind: input, shape index: {}]   ;;  %s547_s1 = inlined_call_operand.vmem [shape: f32[1,8], index: 1, kind: input, shape index: {}]   ;;  %s548_s2 = inlined_call_operand.vmem [shape: f32[64,4], index: 2, kind: input, shape index: {}]   ;;  %s549_s3 = inlined_call_operand.vmem [shape: f32[64,1], index: 3, kind: input, shape index: {}]   ;;  %s550_s4 = inlined_call_operand.vmem [shape: f32[1,64], index: 4, kind: input, shape index: {}]   ;;  %s551_s5 = inlined_call_operand.<no memory space> [shape: f32[1], index: 5, kind: input, shape index: {}]   ;;  %s552_s6 = inlined_call_operand.hbm [shape: f32[1,8], index: 6, kind: output, shape index: {}]  }
   0x1   :  { %v83_v0 = vld [vmem:[%s546_s0] sm:$0xf]  ;;  %v26_v2 = vld [vmem:[%s548_s2 + $0x8] sm:$0xff]  ;;  %v27_v3 = vld [vmem:[%s548_s2 + $0x10] sm:$0xff]  ;;  %400 = vset.pattern.permute.xlu0 %v426_v4  ;;  %401 = vset.pattern.permute.xlu1 %v426_v4 }
   0x2   :  { %v25_v1 = vld [vmem:[%s548_s2] sm:$0xff]  ;;  %350 = vmatprep.subr.msk.mxu0 %vm109_vm0, %v83_v0  ;;  %v37_v6 = vld [vmem:[%s549_s3 + $0x10] sm:$0xff]  ;;  %v28_v7 = vld [vmem:[%s548_s2 + $0x18] sm:$0xff] }
   0x3   :  { %352 = vmatprep.mubr.msk.f32.mxu0 %vm84_vm1, %v25_v1  ;;  %351 = vmatpush3.msk.msra.mxu0 %vm109_vm0, %v83_v0  ;;  %v35_v5 = vld [vmem:[%s549_s3] sm:$0xff]  ;;  %v36_v9 = vld [vmem:[%s549_s3 + $0x8] sm:$0xff] }
   0x4   :  { %353 = vmatmul.mubr.msk.f32.vlgmr.msra.gmra.mrb[0].mxu0 %vm84_vm1, %v26_v2  ;;  %45 = vperm.xlu0 %400, %v35_v5   ;;  %v29_v8 = vld [vmem:[%s548_s2 + $0x20] sm:$0xff] }
   0x5   :  { %355 = vmatprep.mubr.msk.f32.mxu0 %vm84_vm1, %v27_v3  ;;  %55 = vperm.xlu1 %401, %v37_v6  }
   0x6   :  { %12 = vsyncpa [#allocation4], 0  ;;  %v38_v10 = vld [vmem:[%s549_s3 + $0x18] sm:$0xff]  ;;  %v30_v11 = vld [vmem:[%s548_s2 + $0x28] sm:$0xff]  ;;  %v427_v18 = vmov 0.0|0.0   ;;  %vm428_vm2 = vmmov 0   ;;  %v226_v57 = vstv %s551_s5 }
   0x7   :  { %v31_v12 = vld [vmem:[%s548_s2 + $0x30] sm:$0xff]  ;;  %v39_v13 = vld [vmem:[%s549_s3 + $0x20] sm:$0xff]  ;;  %v40_v14 = vld [vmem:[%s549_s3 + $0x28] sm:$0xff]  ;;  %383 = vmatprep.subr.bf16.mxu1 %v427_v18  ;;  %v429_v19 = vmov 0.0   ;;  %vm227_vm3 = vcmask 523264   ;;  %s430_s9 = smov [#allocation3]  }
   0x8   :  { %356 = vmatmul.mubr.msk.f32.gmra.mrb[2].mxu0 %vm84_vm1, %v28_v7  ;;  %50 = vperm.xlu0 %400, %v36_v9   ;;  %v32_v15 = vld [vmem:[%s548_s2 + $0x38] sm:$0xff]  ;;  %v41_v16 = vld [vmem:[%s549_s3 + $0x30] sm:$0xff]  ;;  %v33_v56 = vld [vmem:[%s550_s4] sm:$0x1]  ;;  %s314_s10 = sshll.u32 %s430_s9, 4  ;;  %vm306_vm4 = vcmask 57344   ;;  %s315_s10 = int_to_ptr.vmem [resolvable:$true] %s314_s10 }
   0x9   :  { %358 = vmatprep.mubr.msk.f32.mxu0 %vm84_vm1, %v29_v8  ;;  %60 = vperm.xlu1 %401, %v38_v10   ;;  %v42_v17 = vld [vmem:[%s549_s3 + $0x38] sm:$0xff]  ;;  %v301_v59 = vld [vmem:[%s547_s1] sm:$0x1]  ;;  %s402_s4 = scalar_lea.vmem %s315_s10, 16  ;;  %s406_s11 = scalar_lea.vmem %s315_s10, 32 }
   0xa   :  { %380 = vmatprep.mubr.msk.f32.mxu1 %vm428_vm2, %v429_v19  ;;  %p403_p0 = scmp.ne.s32.totalorder %s315_s10, %s402_s4  ;;  %p407_p1 = scmp.lt.s32.totalorder %s315_s10, %s315_s10 }
   0xb   :  { %p408_p2 = scmp.lt.s32.totalorder %s406_s11, %s402_s4 }
   0xc   :  { %359 = vmatmul.mubr.msk.f32.gmra.mrb[4].mxu0 %vm84_vm1, %v30_v11  ;;  %65 = vperm.xlu0 %400, %v39_v13  }
   0xd   :  { %361 = vmatprep.mubr.msk.f32.mxu0 %vm84_vm1, %v31_v12  ;;  %70 = vperm.xlu1 %401, %v40_v14   ;;  %p409_p3 = por %p408_p2, %p407_p1 }
   0xf   :  { %p410_p4 = pnand %p409_p3, %p403_p0 }
  0x10   :  { %362 = vmatmul.mubr.msk.f32.gmra.mrb[6].mxu0 %vm84_vm1, %v32_v15  ;;  %75 = vperm.xlu0 %400, %v41_v16  }
  0x11   :  { %80 = vperm.xlu1 %401, %v42_v17  }
  0x83   :  { %v46_v20 = vpop.permute.xlu0 %45 }
  0x84   :  { %v56_v21 = vpop.permute.xlu1 %55 }
  0x87   :  { %v51_v22 = vpop.permute.xlu0 %50 }
  0x88   :  { %v61_v23 = vpop.permute.xlu1 %60 }
  0x8b   :  { %v66_v36 = vpop.permute.xlu0 %65 }
  0x8c   :  { %v71_v33 = vpop.permute.xlu1 %70 }
  0x8f   :  { %v76_v48 = vpop.permute.xlu0 %75 }
  0x90   :  { %v81_v45 = vpop.permute.xlu1 %80 }
  0xd7   :  { %v354_v24 = vpop.f32.mrb[0].mxu0 }
  0xd8   :  { %v185_v25 = vadd.f32 %v354_v24, %v51_v22  ;;  %v179_v26 = vpop.f32.mrb[1].mxu0 }
  0xd9   :  { %v180_v27 = vadd.f32 %v179_v26, %v46_v20 }
  0xda   :  { %v219_v28 = vmax.f32 %v185_v25, 0.0 }
  0xdb   :  { %v218_v29 = vmax.f32 %v180_v27, 0.0  ;;  %v357_v30 = vpop.f32.mrb[2].mxu0 }
  0xdc   :  { %v195_v31 = vadd.f32 %v357_v30, %v61_v23  ;;  %v189_v32 = vpop.f32.mrb[3].mxu0 }
  0xdd   :  { %v190_v34 = vadd.f32 %v189_v32, %v56_v21  ;;  %v384_v35 = vpack.c.bf16 %v219_v28, %v218_v29 }
  0xde   :  { %v221_v37 = vmax.f32 %v195_v31, 0.0 }
  0xdf   :  { %v220_v38 = vmax.f32 %v190_v34, 0.0  ;;  %v360_v39 = vpop.f32.mrb[4].mxu0  ;;  %385 = vmatpush3.bf16.msra.mxu1 %v384_v35 }
  0xe0   :  { %v205_v40 = vadd.f32 %v360_v39, %v71_v33  ;;  %v199_v41 = vpop.f32.mrb[5].mxu0  ;;  %386 = vmatprep.subr.bf16.mxu1 %v427_v18 }
  0xe1   :  { %v387_v42 = vpack.c.bf16 %v221_v37, %v220_v38  ;;  %v200_v43 = vadd.f32 %v199_v41, %v66_v36 }
  0xe2   :  { %v223_v44 = vmax.f32 %v205_v40, 0.0 }
  0xe3   :  { %v222_v46 = vmax.f32 %v200_v43, 0.0  ;;  %v363_v47 = vpop.f32.mrb[6].mxu0  ;;  %388 = vmatpush3.bf16.msra.mxu1 %v387_v42 }
  0xe4   :  { %v215_v49 = vadd.f32 %v363_v47, %v81_v45  ;;  %v209_v50 = vpop.f32.mrb[7].mxu0  ;;  %389 = vmatprep.subr.bf16.mxu1 %v427_v18 }
  0xe5   :  { %v390_v51 = vpack.c.bf16 %v223_v44, %v222_v46  ;;  %v210_v52 = vadd.f32 %v209_v50, %v76_v48 }
  0xe6   :  { %v225_v53 = vmax.f32 %v215_v49, 0.0 }
  0xe7   :  { %v224_v54 = vmax.f32 %v210_v52, 0.0  ;;  %391 = vmatpush3.bf16.msra.mxu1 %v390_v51 }
  0xe8   :  { %392 = vmatprep.subr.bf16.mxu1 %v427_v18 }
  0xe9   :  { %v393_v55 = vpack.c.bf16 %v225_v53, %v224_v54 }
  0xeb   :  { %394 = vmatpush3.bf16.msra.mxu1 %v393_v55 }
  0xee   :  { %381 = vmatmul.mubr.msk.f32.vlgmr.msra.gmra.mrb[0].mxu1 %vm227_vm3, %v33_v56 }
 0x1c1   :  { %v297_v58 = vpop.f32.mrb[0].mxu1 }
 0x1c2   :  { %v298_v60 = vadd.f32 %v297_v58, %v226_v57  ;;  %v382_v61 = vpop.f32.mrb[1].mxu1 }
 0x1c4   :  { %v302_v62 = vsub.f32 %v301_v59, %v298_v60 }
 0x1c6   :  { %v303_v63 = vmul.f32 %v302_v62, %v302_v62 }
 0x1c8   :  { %v304_v0 = vmul.f32 -0.5, %v303_v63 }
 0x1ca   :  { %v305_v1 = vadd.f32 -0.9189385, %v304_v0 }
 0x1cc   :  { %307 = vst.msk [vmem:[#allocation3] sm:$0x1] %vm306_vm4, %v305_v1 }
 0x1cd   :  { %413 = shalt.err (!%p410_p4)
}
 0x1ce   :  { %s414_s12 = scalar_lea.hbm %s552_s6, 16 }
 0x1cf   :  { %p415_p5 = scmp.ne.s32.totalorder %s552_s6, %s414_s12  ;;  %p418_p6 = scmp.lt.u32.totalorder %s414_s12, %s552_s6 }
 0x1d1   :  { %p420_p7 = pnand %p418_p6, %p415_p5 }
 0x1d3   :  { %423 = shalt.err (!%p420_p7)
}
 0x1d4   :  { %317 = dma.vmem_to_hbm [thread:$0]  %s315_s10, 16, %s552_s6, [#allocation4]  }
 0x1d5   :  { %424 = dma.done.wait [#allocation4], 16  }
 0x1d6   :  { %425 = vsyncadd [#allocation4], 4294967280 }
 0x1d7   :  { %321 = vsyncpa [#allocation4], 1 }

</bundles_post_ra>
